<compile_context>
chip_gen: v5e
topology: v5e:2x2
jax: 0.10.0
libtpu: 0.0.40
codegen_flags: <defaults>
</compile_context>

<pallas_src>
import jax
import jax.numpy as jnp
from jax.experimental import pallas as pl
from jax.experimental.pallas import tpu as pltpu

VOCAB = 50
EMBED = 16
SENT_LEN = 8
PAD_IDX = 0
OUT_CH = 100
C_PAD = 128                                   # OUT_CH padded to one lane width
KERNEL_SIZES = (3, 4, 5)
T_SIZES = tuple(SENT_LEN - k + 1 for k in KERNEL_SIZES)   # (6, 5, 4)
LE = SENT_LEN * EMBED                         # 128 -> exactly one lane width
NCOL = sum(T_SIZES) * C_PAD                   # 15 * 128 = 1920


def convmodel2_kernel(x_ref, wbig_ref, bias_ref, lw_ref, lb_ref, out_ref):
    # x: (bt, 128) bf16.  wbig: (128, 1920) bf16, 15 lane-aligned column blocks
    # (one per (branch, time) pair).  Each block is an independent MXU matmul whose
    # f32 result feeds a per-branch running max -- no (bt, 1920) intermediate.
    x = x_ref[...]
    z = None
    col = 0
    for bi, T in enumerate(T_SIZES):
        m = jnp.dot(x, wbig_ref[:, col:col + C_PAD],
                    preferred_element_type=jnp.float32)
        for t in range(1, T):
            c0 = col + t * C_PAD
            m = jnp.maximum(
                m, jnp.dot(x, wbig_ref[:, c0:c0 + C_PAD],
                           preferred_element_type=jnp.float32))
        # Deferred bias + ReLU (bias constant over time, ReLU monotone => exact).
        pooled = jnp.maximum(m + bias_ref[bi:bi + 1, :], 0.0)      # (bt, 128)
        # Linear(300 -> 1): per-branch lane reduction; padded channels carry zero
        # weight so they contribute nothing.
        contrib = jnp.sum(pooled * lw_ref[bi:bi + 1, :], axis=-1, keepdims=True)
        z = contrib if z is None else z + contrib
        col += T * C_PAD

    z = z + lb_ref[...]
    # TODO(synk): nn.Dropout(0.2) is identity in eval mode, omitted.
    # Exact sigmoid: exp + exact reciprocal both ride the EUP slot.
    out_ref[...] = 1.0 / (1.0 + jnp.exp(-z))


def init_params(key):
    """Deterministic synthetic parameters in the PyTorch layout."""
    keys = jax.random.split(key, 10)
    p = {}
    emb = 0.1 * jax.random.normal(keys[0], (VOCAB, EMBED), jnp.float32)
    p["embedding"] = emb.at[PAD_IDX].set(0.0)                 # padding_idx row zeroed
    for i, k in enumerate(KERNEL_SIZES):
        p[f"conv{k}_w"] = 0.1 * jax.random.normal(
            keys[1 + 2 * i], (OUT_CH, 1, k, EMBED), jnp.float32)   # Conv2d weight
        p[f"conv{k}_b"] = 0.1 * jax.random.normal(
            keys[2 + 2 * i], (OUT_CH,), jnp.float32)
    # nn.Linear(300, 1): stored already transposed as the (in, out) matmul weight.
    p["linear_w"] = 0.1 * jax.random.normal(keys[7], (OUT_CH * 3, 1), jnp.float32)
    p["linear_b"] = 0.1 * jax.random.normal(keys[8], (1, 1), jnp.float32)
    return p


def prepare_kernel_params(p):
    """Fold im2col + channel padding into a banded weight (done once per model)."""
    w_big = jnp.zeros((LE, NCOL), jnp.float32)
    col = 0
    for k, T in zip(KERNEL_SIZES, T_SIZES):
        w = p[f"conv{k}_w"].reshape(OUT_CH, k * EMBED).T       # (k*E, C) matmul weight
        for t in range(T):
            c0 = col + t * C_PAD
            w_big = w_big.at[t * EMBED:(t + k) * EMBED, c0:c0 + OUT_CH].set(w)
        col += T * C_PAD

    nb = len(KERNEL_SIZES)
    bias_rows = jnp.zeros((nb, C_PAD), jnp.float32)            # per-branch conv bias
    lin_rows = jnp.zeros((nb, C_PAD), jnp.float32)             # per-branch linear rows
    for i, k in enumerate(KERNEL_SIZES):
        bias_rows = bias_rows.at[i, :OUT_CH].set(p[f"conv{k}_b"])
        lin_rows = lin_rows.at[i, :OUT_CH].set(
            p["linear_w"][i * OUT_CH:(i + 1) * OUT_CH, 0])

    return {
        "embedding": p["embedding"],
        "w_big": w_big.astype(jnp.bfloat16),     # bf16 MXU operand, f32 accumulate
        "bias": bias_rows,                       # (3, 128) f32
        "lw": lin_rows,                          # (3, 128) f32
        "lb": p["linear_b"],                     # (1, 1) f32
    }


def _cdiv(a, b):
    return -(-a // b)


def _round_up(x, m):
    return _cdiv(x, m) * m


def _pick_bt(B, batch_tile):
    """Batch-tile selection: multiple of 16 (bf16 sublane packing), large tiles to
    amortize per-grid-step overhead, >=2 grid steps when the batch allows (v7x dual
    TensorCore), and sized to divide the padded batch (no dead tiles)."""
    req = max(16, min(int(batch_tile), 1024))
    req -= req % 16
    B16 = _round_up(B, 16)
    if B16 <= 16:
        return 16
    if B16 <= req:
        # Fits in one requested tile: split into two steps so both v7x TCs get work.
        return _round_up(_cdiv(B16, 2), 16) if B16 >= 32 else B16
    # Large batch: as many tiles of <= req as needed, sized to avoid padded tiles.
    n = _cdiv(B16, req)
    return _round_up(_cdiv(B16, n), 16)


def conv_model2_forward(tokens, kp, *, batch_tile=1024):
    B = tokens.shape[0]
    # Embedding gather stays in XLA (3.2 KB table); only (B, 128) bf16 is streamed.
    emb = jnp.take(kp["embedding"], tokens, axis=0)            # (B, L, E) f32
    x = emb.reshape(B, LE).astype(jnp.bfloat16)                # (B, 128) bf16

    bt = _pick_bt(B, batch_tile)
    B_pad = _round_up(B, bt)
    if B_pad != B:
        x = jnp.pad(x, ((0, B_pad - B), (0, 0)))

    grid = (B_pad // bt,)
    cost = pl.CostEstimate(
        flops=2 * B_pad * LE * NCOL + 6 * B_pad * sum(T_SIZES) * C_PAD,
        transcendentals=B_pad,
        bytes_accessed=(B_pad * LE * 2 + LE * NCOL * 2
                        + 2 * 3 * C_PAD * 4 + 4 + B_pad * 4),
    )

    out = pl.pallas_call(
        convmodel2_kernel,
        out_shape=jax.ShapeDtypeStruct((B_pad, 1), jnp.float32),
        grid=grid,
        in_specs=[
            pl.BlockSpec((bt, LE), lambda b: (b, 0)),      # embedding tile (streamed)
            pl.BlockSpec((LE, NCOL), lambda b: (0, 0)),    # banded conv weight (resident)
            pl.BlockSpec((3, C_PAD), lambda b: (0, 0)),    # per-branch conv bias
            pl.BlockSpec((3, C_PAD), lambda b: (0, 0)),    # per-branch linear rows
            pl.BlockSpec((1, 1), lambda b: (0, 0)),        # linear bias
        ],
        out_specs=pl.BlockSpec((bt, 1), lambda b: (b, 0)),
        compiler_params=pltpu.CompilerParams(
            dimension_semantics=("parallel",),             # megacore / pipelined batch
        ),
        cost_estimate=cost,
    )(x, kp["w_big"], kp["bias"], kp["lw"], kp["lb"])
    return out[:B]


def conv_model2_reference(tokens, p):
    """Pure-JAX f32 reference of the PyTorch forward (eval mode)."""
    emb = jnp.take(p["embedding"], tokens, axis=0)             # (B, L, E)
    B = tokens.shape[0]
    feats = []
    for k in KERNEL_SIZES:
        T = SENT_LEN - k + 1
        win = jnp.stack(
            [emb[:, t:t + k, :].reshape(B, k * EMBED) for t in range(T)], axis=1)
        w = p[f"conv{k}_w"].reshape(OUT_CH, k * EMBED).T
        s = jnp.einsum("btk,kc->btc", win, w) + p[f"conv{k}_b"][None, None, :]
        feats.append(jnp.max(jax.nn.relu(s), axis=1))          # (B, C)
    feat = jnp.concatenate(feats, axis=1)                      # (B, 3C)
    z = feat @ p["linear_w"] + p["linear_b"]
    return jax.nn.sigmoid(z)


if __name__ == "__main__":
    key = jax.random.PRNGKey(0)
    k_tok, k_tok2, k_par = jax.random.split(key, 3)

    params = init_params(k_par)
    kparams = prepare_kernel_params(params)

    # Small test (batch=2, seq=8): single 16-row tile.
    B = 2
    tokens = jax.random.randint(k_tok, (B, SENT_LEN), 0, VOCAB, dtype=jnp.int32)
    out = jax.block_until_ready(conv_model2_forward(tokens, kparams))
    ref = conv_model2_reference(tokens, params)
    assert out.shape == (B, 1) and out.dtype == jnp.float32
    # Tolerance covers bf16 MXU operands.
    assert jnp.allclose(out, ref, atol=2e-3, rtol=2e-3)

    # Larger batch, default tile selection: bt=192, grid=2, zero batch padding.
    B2 = 384
    tokens2 = jax.random.randint(k_tok2, (B2, SENT_LEN), 0, VOCAB, dtype=jnp.int32)
    out2 = jax.block_until_ready(conv_model2_forward(tokens2, kparams))
    ref2 = conv_model2_reference(tokens2, params)
    assert out2.shape == (B2, 1)
    assert jnp.allclose(out2, ref2, atol=2e-3, rtol=2e-3)

    # Same batch with an explicit smaller tile (bt=128, grid=3) to exercise the
    # multi-step pipelined path.
    out3 = jax.block_until_ready(conv_model2_forward(tokens2, kparams, batch_tile=128))
    assert jnp.allclose(out3, ref2, atol=2e-3, rtol=2e-3)

    print("KERNEL_OK")
</pallas_src>

<mosaic_0001>
module attributes {stable_mosaic.version = 11 : i64} {
  func.func @convmodel2_kernel(%arg0: i32, %arg1: memref<16x128xbf16, #tpu.memory_space<vmem>>, %arg2: memref<128x1920xbf16, #tpu.memory_space<vmem>>, %arg3: memref<3x128xf32, #tpu.memory_space<vmem>>, %arg4: memref<3x128xf32, #tpu.memory_space<vmem>>, %arg5: memref<1x1xf32, #tpu.memory_space<vmem>>, %arg6: memref<16x1xf32, #tpu.memory_space<vmem>>) attributes {dimension_semantics = [#tpu.dimension_semantics<parallel>], iteration_bounds = array<i64: 1>, scalar_prefetch = 0 : i64, scratch_operands = 0 : i64, tpu.core_type = #tpu.core_type<tc>, window_params = [{transform_indices = @transform_0, window_bounds = array<i64: 16, 128>}, {pipeline_mode = #tpu.pipeline_mode<synchronous>, transform_indices = @transform_1, window_bounds = array<i64: 128, 1920>}, {pipeline_mode = #tpu.pipeline_mode<synchronous>, transform_indices = @transform_2, window_bounds = array<i64: 3, 128>}, {pipeline_mode = #tpu.pipeline_mode<synchronous>, transform_indices = @transform_3, window_bounds = array<i64: 3, 128>}, {pipeline_mode = #tpu.pipeline_mode<synchronous>, transform_indices = @transform_4, window_bounds = array<i64: 1, 1>}, {transform_indices = @transform_5, window_bounds = array<i64: 16, 1>}]} {
    %c0 = arith.constant 0 : index
    %c0_0 = arith.constant 0 : index
    %0 = vector.load %arg1[%c0, %c0_0] : memref<16x128xbf16, #tpu.memory_space<vmem>>, vector<16x128xbf16>
    %c0_1 = arith.constant 0 : index
    %c0_2 = arith.constant 0 : index
    %1 = vector.load %arg2[%c0_1, %c0_2] : memref<128x1920xbf16, #tpu.memory_space<vmem>>, vector<128x128xbf16>
    %cst = arith.constant dense<0.000000e+00> : vector<16x128xf32>
    %2 = tpu.matmul %0, %1, %cst {dimension_numbers = #tpu.dot_dimension_numbers<[1], [0], [0], [1], [0, 0, 1, 1], [], []>} : vector<16x128xbf16>, vector<128x128xbf16>, vector<16x128xf32> -> vector<16x128xf32>
    %c0_3 = arith.constant 0 : index
    %c128 = arith.constant 128 : index
    %3 = vector.load %arg2[%c0_3, %c128] : memref<128x1920xbf16, #tpu.memory_space<vmem>>, vector<128x128xbf16>
    %cst_4 = arith.constant dense<0.000000e+00> : vector<16x128xf32>
    %4 = tpu.matmul %0, %3, %cst_4 {dimension_numbers = #tpu.dot_dimension_numbers<[1], [0], [0], [1], [0, 0, 1, 1], [], []>} : vector<16x128xbf16>, vector<128x128xbf16>, vector<16x128xf32> -> vector<16x128xf32>
    %5 = arith.maximumf %2, %4 : vector<16x128xf32>
    %c0_5 = arith.constant 0 : index
    %c256 = arith.constant 256 : index
    %6 = vector.load %arg2[%c0_5, %c256] : memref<128x1920xbf16, #tpu.memory_space<vmem>>, vector<128x128xbf16>
    %cst_6 = arith.constant dense<0.000000e+00> : vector<16x128xf32>
    %7 = tpu.matmul %0, %6, %cst_6 {dimension_numbers = #tpu.dot_dimension_numbers<[1], [0], [0], [1], [0, 0, 1, 1], [], []>} : vector<16x128xbf16>, vector<128x128xbf16>, vector<16x128xf32> -> vector<16x128xf32>
    %8 = arith.maximumf %5, %7 : vector<16x128xf32>
    %c0_7 = arith.constant 0 : index
    %c384 = arith.constant 384 : index
    %9 = vector.load %arg2[%c0_7, %c384] : memref<128x1920xbf16, #tpu.memory_space<vmem>>, vector<128x128xbf16>
    %cst_8 = arith.constant dense<0.000000e+00> : vector<16x128xf32>
    %10 = tpu.matmul %0, %9, %cst_8 {dimension_numbers = #tpu.dot_dimension_numbers<[1], [0], [0], [1], [0, 0, 1, 1], [], []>} : vector<16x128xbf16>, vector<128x128xbf16>, vector<16x128xf32> -> vector<16x128xf32>
    %11 = arith.maximumf %8, %10 : vector<16x128xf32>
    %c0_9 = arith.constant 0 : index
    %c512 = arith.constant 512 : index
    %12 = vector.load %arg2[%c0_9, %c512] : memref<128x1920xbf16, #tpu.memory_space<vmem>>, vector<128x128xbf16>
    %cst_10 = arith.constant dense<0.000000e+00> : vector<16x128xf32>
    %13 = tpu.matmul %0, %12, %cst_10 {dimension_numbers = #tpu.dot_dimension_numbers<[1], [0], [0], [1], [0, 0, 1, 1], [], []>} : vector<16x128xbf16>, vector<128x128xbf16>, vector<16x128xf32> -> vector<16x128xf32>
    %14 = arith.maximumf %11, %13 : vector<16x128xf32>
    %c0_11 = arith.constant 0 : index
    %c640 = arith.constant 640 : index
    %15 = vector.load %arg2[%c0_11, %c640] : memref<128x1920xbf16, #tpu.memory_space<vmem>>, vector<128x128xbf16>
    %cst_12 = arith.constant dense<0.000000e+00> : vector<16x128xf32>
    %16 = tpu.matmul %0, %15, %cst_12 {dimension_numbers = #tpu.dot_dimension_numbers<[1], [0], [0], [1], [0, 0, 1, 1], [], []>} : vector<16x128xbf16>, vector<128x128xbf16>, vector<16x128xf32> -> vector<16x128xf32>
    %17 = arith.maximumf %14, %16 : vector<16x128xf32>
    %c0_13 = arith.constant 0 : index
    %c0_14 = arith.constant 0 : index
    %18 = vector.load %arg3[%c0_13, %c0_14] : memref<3x128xf32, #tpu.memory_space<vmem>>, vector<1x128xf32>
    %19 = vector.broadcast %18 : vector<1x128xf32> to vector<16x128xf32>
    %20 = arith.addf %17, %19 : vector<16x128xf32>
    %cst_15 = arith.constant 0.000000e+00 : f32
    %21 = vector.broadcast %cst_15 : f32 to vector<16x128xf32>
    %22 = arith.maximumf %20, %21 : vector<16x128xf32>
    %c0_16 = arith.constant 0 : index
    %c0_17 = arith.constant 0 : index
    %23 = vector.load %arg4[%c0_16, %c0_17] : memref<3x128xf32, #tpu.memory_space<vmem>>, vector<1x128xf32>
    %24 = vector.broadcast %23 : vector<1x128xf32> to vector<16x128xf32>
    %25 = arith.mulf %22, %24 : vector<16x128xf32>
    %cst_18 = arith.constant dense<0.000000e+00> : vector<16xf32>
    %26 = vector.multi_reduction <add>, %25, %cst_18 [1] : vector<16x128xf32> to vector<16xf32>
    %27 = vector.shape_cast %26 : vector<16xf32> to vector<16x1xf32>
    %c0_19 = arith.constant 0 : index
    %c768 = arith.constant 768 : index
    %28 = vector.load %arg2[%c0_19, %c768] : memref<128x1920xbf16, #tpu.memory_space<vmem>>, vector<128x128xbf16>
    %cst_20 = arith.constant dense<0.000000e+00> : vector<16x128xf32>
    %29 = tpu.matmul %0, %28, %cst_20 {dimension_numbers = #tpu.dot_dimension_numbers<[1], [0], [0], [1], [0, 0, 1, 1], [], []>} : vector<16x128xbf16>, vector<128x128xbf16>, vector<16x128xf32> -> vector<16x128xf32>
    %c0_21 = arith.constant 0 : index
    %c896 = arith.constant 896 : index
    %30 = vector.load %arg2[%c0_21, %c896] : memref<128x1920xbf16, #tpu.memory_space<vmem>>, vector<128x128xbf16>
    %cst_22 = arith.constant dense<0.000000e+00> : vector<16x128xf32>
    %31 = tpu.matmul %0, %30, %cst_22 {dimension_numbers = #tpu.dot_dimension_numbers<[1], [0], [0], [1], [0, 0, 1, 1], [], []>} : vector<16x128xbf16>, vector<128x128xbf16>, vector<16x128xf32> -> vector<16x128xf32>
    %32 = arith.maximumf %29, %31 : vector<16x128xf32>
    %c0_23 = arith.constant 0 : index
    %c1024 = arith.constant 1024 : index
    %33 = vector.load %arg2[%c0_23, %c1024] : memref<128x1920xbf16, #tpu.memory_space<vmem>>, vector<128x128xbf16>
    %cst_24 = arith.constant dense<0.000000e+00> : vector<16x128xf32>
    %34 = tpu.matmul %0, %33, %cst_24 {dimension_numbers = #tpu.dot_dimension_numbers<[1], [0], [0], [1], [0, 0, 1, 1], [], []>} : vector<16x128xbf16>, vector<128x128xbf16>, vector<16x128xf32> -> vector<16x128xf32>
    %35 = arith.maximumf %32, %34 : vector<16x128xf32>
    %c0_25 = arith.constant 0 : index
    %c1152 = arith.constant 1152 : index
    %36 = vector.load %arg2[%c0_25, %c1152] : memref<128x1920xbf16, #tpu.memory_space<vmem>>, vector<128x128xbf16>
    %cst_26 = arith.constant dense<0.000000e+00> : vector<16x128xf32>
    %37 = tpu.matmul %0, %36, %cst_26 {dimension_numbers = #tpu.dot_dimension_numbers<[1], [0], [0], [1], [0, 0, 1, 1], [], []>} : vector<16x128xbf16>, vector<128x128xbf16>, vector<16x128xf32> -> vector<16x128xf32>
    %38 = arith.maximumf %35, %37 : vector<16x128xf32>
    %c0_27 = arith.constant 0 : index
    %c1280 = arith.constant 1280 : index
    %39 = vector.load %arg2[%c0_27, %c1280] : memref<128x1920xbf16, #tpu.memory_space<vmem>>, vector<128x128xbf16>
    %cst_28 = arith.constant dense<0.000000e+00> : vector<16x128xf32>
    %40 = tpu.matmul %0, %39, %cst_28 {dimension_numbers = #tpu.dot_dimension_numbers<[1], [0], [0], [1], [0, 0, 1, 1], [], []>} : vector<16x128xbf16>, vector<128x128xbf16>, vector<16x128xf32> -> vector<16x128xf32>
    %41 = arith.maximumf %38, %40 : vector<16x128xf32>
    %c1 = arith.constant 1 : index
    %c0_29 = arith.constant 0 : index
    %42 = vector.load %arg3[%c1, %c0_29] : memref<3x128xf32, #tpu.memory_space<vmem>>, vector<1x128xf32>
    %43 = vector.broadcast %42 : vector<1x128xf32> to vector<16x128xf32>
    %44 = arith.addf %41, %43 : vector<16x128xf32>
    %cst_30 = arith.constant 0.000000e+00 : f32
    %45 = vector.broadcast %cst_30 : f32 to vector<16x128xf32>
    %46 = arith.maximumf %44, %45 : vector<16x128xf32>
    %c1_31 = arith.constant 1 : index
    %c0_32 = arith.constant 0 : index
    %47 = vector.load %arg4[%c1_31, %c0_32] : memref<3x128xf32, #tpu.memory_space<vmem>>, vector<1x128xf32>
    %48 = vector.broadcast %47 : vector<1x128xf32> to vector<16x128xf32>
    %49 = arith.mulf %46, %48 : vector<16x128xf32>
    %cst_33 = arith.constant dense<0.000000e+00> : vector<16xf32>
    %50 = vector.multi_reduction <add>, %49, %cst_33 [1] : vector<16x128xf32> to vector<16xf32>
    %51 = vector.shape_cast %50 : vector<16xf32> to vector<16x1xf32>
    %52 = arith.addf %27, %51 : vector<16x1xf32>
    %c0_34 = arith.constant 0 : index
    %c1408 = arith.constant 1408 : index
    %53 = vector.load %arg2[%c0_34, %c1408] : memref<128x1920xbf16, #tpu.memory_space<vmem>>, vector<128x128xbf16>
    %cst_35 = arith.constant dense<0.000000e+00> : vector<16x128xf32>
    %54 = tpu.matmul %0, %53, %cst_35 {dimension_numbers = #tpu.dot_dimension_numbers<[1], [0], [0], [1], [0, 0, 1, 1], [], []>} : vector<16x128xbf16>, vector<128x128xbf16>, vector<16x128xf32> -> vector<16x128xf32>
    %c0_36 = arith.constant 0 : index
    %c1536 = arith.constant 1536 : index
    %55 = vector.load %arg2[%c0_36, %c1536] : memref<128x1920xbf16, #tpu.memory_space<vmem>>, vector<128x128xbf16>
    %cst_37 = arith.constant dense<0.000000e+00> : vector<16x128xf32>
    %56 = tpu.matmul %0, %55, %cst_37 {dimension_numbers = #tpu.dot_dimension_numbers<[1], [0], [0], [1], [0, 0, 1, 1], [], []>} : vector<16x128xbf16>, vector<128x128xbf16>, vector<16x128xf32> -> vector<16x128xf32>
    %57 = arith.maximumf %54, %56 : vector<16x128xf32>
    %c0_38 = arith.constant 0 : index
    %c1664 = arith.constant 1664 : index
    %58 = vector.load %arg2[%c0_38, %c1664] : memref<128x1920xbf16, #tpu.memory_space<vmem>>, vector<128x128xbf16>
    %cst_39 = arith.constant dense<0.000000e+00> : vector<16x128xf32>
    %59 = tpu.matmul %0, %58, %cst_39 {dimension_numbers = #tpu.dot_dimension_numbers<[1], [0], [0], [1], [0, 0, 1, 1], [], []>} : vector<16x128xbf16>, vector<128x128xbf16>, vector<16x128xf32> -> vector<16x128xf32>
    %60 = arith.maximumf %57, %59 : vector<16x128xf32>
    %c0_40 = arith.constant 0 : index
    %c1792 = arith.constant 1792 : index
    %61 = vector.load %arg2[%c0_40, %c1792] : memref<128x1920xbf16, #tpu.memory_space<vmem>>, vector<128x128xbf16>
    %cst_41 = arith.constant dense<0.000000e+00> : vector<16x128xf32>
    %62 = tpu.matmul %0, %61, %cst_41 {dimension_numbers = #tpu.dot_dimension_numbers<[1], [0], [0], [1], [0, 0, 1, 1], [], []>} : vector<16x128xbf16>, vector<128x128xbf16>, vector<16x128xf32> -> vector<16x128xf32>
    %63 = arith.maximumf %60, %62 : vector<16x128xf32>
    %c2 = arith.constant 2 : index
    %c0_42 = arith.constant 0 : index
    %64 = vector.load %arg3[%c2, %c0_42] : memref<3x128xf32, #tpu.memory_space<vmem>>, vector<1x128xf32>
    %65 = vector.broadcast %64 : vector<1x128xf32> to vector<16x128xf32>
    %66 = arith.addf %63, %65 : vector<16x128xf32>
    %cst_43 = arith.constant 0.000000e+00 : f32
    %67 = vector.broadcast %cst_43 : f32 to vector<16x128xf32>
    %68 = arith.maximumf %66, %67 : vector<16x128xf32>
    %c2_44 = arith.constant 2 : index
    %c0_45 = arith.constant 0 : index
    %69 = vector.load %arg4[%c2_44, %c0_45] : memref<3x128xf32, #tpu.memory_space<vmem>>, vector<1x128xf32>
    %70 = vector.broadcast %69 : vector<1x128xf32> to vector<16x128xf32>
    %71 = arith.mulf %68, %70 : vector<16x128xf32>
    %cst_46 = arith.constant dense<0.000000e+00> : vector<16xf32>
    %72 = vector.multi_reduction <add>, %71, %cst_46 [1] : vector<16x128xf32> to vector<16xf32>
    %73 = vector.shape_cast %72 : vector<16xf32> to vector<16x1xf32>
    %74 = arith.addf %52, %73 : vector<16x1xf32>
    %c0_47 = arith.constant 0 : index
    %c0_48 = arith.constant 0 : index
    %75 = vector.load %arg5[%c0_47, %c0_48] : memref<1x1xf32, #tpu.memory_space<vmem>>, vector<1x1xf32>
    %76 = vector.broadcast %75 : vector<1x1xf32> to vector<16x1xf32>
    %77 = arith.addf %74, %76 : vector<16x1xf32>
    %cst_49 = arith.constant 0.000000e+00 : f32
    %78 = vector.broadcast %cst_49 : f32 to vector<16x1xf32>
    %79 = arith.subf %78, %77 : vector<16x1xf32>
    %80 = math.exp %79 : vector<16x1xf32>
    %cst_50 = arith.constant 1.000000e+00 : f32
    %81 = vector.broadcast %cst_50 : f32 to vector<16x1xf32>
    %82 = arith.addf %81, %80 : vector<16x1xf32>
    %cst_51 = arith.constant 1.000000e+00 : f32
    %83 = vector.broadcast %cst_51 : f32 to vector<16x1xf32>
    %84 = arith.divf %83, %82 : vector<16x1xf32>
    %c0_52 = arith.constant 0 : index
    %c0_53 = arith.constant 0 : index
    %85 = vector.load %arg6[%c0_52, %c0_53] : memref<16x1xf32, #tpu.memory_space<vmem>>, vector<16x1xf32>
    tpu.vector_store %arg6[%c0_52, %c0_53], %84 {strides = array<i32>} : memref<16x1xf32, #tpu.memory_space<vmem>>, vector<16x1xf32>,
    return
  }
  func.func @transform_0(%arg0: i32) -> (i32, i32) {
    %c0_i32 = arith.constant 0 : i32
    %c0_i32_0 = arith.constant 0 : i32
    return %arg0, %c0_i32 : i32, i32
  }
  func.func @transform_1(%arg0: i32) -> (i32, i32) {
    %c0_i32 = arith.constant 0 : i32
    %c0_i32_0 = arith.constant 0 : i32
    %c0_i32_1 = arith.constant 0 : i32
    return %c0_i32, %c0_i32_0 : i32, i32
  }
  func.func @transform_2(%arg0: i32) -> (i32, i32) {
    %c0_i32 = arith.constant 0 : i32
    %c0_i32_0 = arith.constant 0 : i32
    %c0_i32_1 = arith.constant 0 : i32
    return %c0_i32, %c0_i32_0 : i32, i32
  }
  func.func @transform_3(%arg0: i32) -> (i32, i32) {
    %c0_i32 = arith.constant 0 : i32
    %c0_i32_0 = arith.constant 0 : i32
    %c0_i32_1 = arith.constant 0 : i32
    return %c0_i32, %c0_i32_0 : i32, i32
  }
  func.func @transform_4(%arg0: i32) -> (i32, i32) {
    %c0_i32 = arith.constant 0 : i32
    %c0_i32_0 = arith.constant 0 : i32
    %c0_i32_1 = arith.constant 0 : i32
    return %c0_i32, %c0_i32_0 : i32, i32
  }
  func.func @transform_5(%arg0: i32) -> (i32, i32) {
    %c0_i32 = arith.constant 0 : i32
    %c0_i32_0 = arith.constant 0 : i32
    return %arg0, %c0_i32 : i32, i32
  }
}

</mosaic_0001>

<bundles_post_ra>
// kernel: tpu_custom_call.1
= control target key start
LH: loop header
LB: loop body
LE: loop exit
PB: predicated region body
PF: predicated region fallthrough
CT: control target
= control target key end

     0   :  { %s2154_s0 = inlined_call_operand.hbm [shape: bf16[16,128], index: 0, kind: input, shape index: {}]   ;;  %s2155_s1 = inlined_call_operand.hbm [shape: bf16[128,1920], index: 1, kind: input, shape index: {}]   ;;  %s2156_s2 = inlined_call_operand.hbm [shape: f32[3,128], index: 2, kind: input, shape index: {}]   ;;  %s2157_s3 = inlined_call_operand.vmem [shape: f32[3,128], index: 3, kind: input, shape index: {}]   ;;  %s2158_s4 = inlined_call_operand.<no memory space> [shape: f32[1,1], index: 4, kind: input, shape index: {}]   ;;  %s2159_s5 = inlined_call_operand.vmem [shape: f32[16,1], index: 5, kind: output, shape index: {}]  }
   0x1   :  { %v10_v0 = vstv %s2158_s4 }
   0x2   :  { %11 = vst [vmem:[#allocation2] sm:$0x1] %v10_v0 }
   0x3   :  { %12 = vsyncpa [#allocation4], 0 }
   0x4   :  { %13 = vsyncpa [#allocation6], 0  ;;  %s31_s22 = sshll.u32 %s2155_s1, 4  ;;  %s2071_s23 = smov [#allocation5]   ;;  %s32_s22 = int_to_ptr.hbm [resolvable:$true] %s31_s22 }
   0x5   :  { %s33_s24 = sshll.u32 %s2071_s23, 4  ;;  %s18_s27 = sshll.u32 %s2154_s0, 4  ;;  %s34_s24 = int_to_ptr.vmem [resolvable:$true] %s33_s24  ;;  %s19_s27 = int_to_ptr.hbm [resolvable:$true] %s18_s27 }
   0x6   :  { %s2072_s28 = smov 960   ;;  %s2073_s29 = smov 60  }
   0x7   :  { %39 = dma.hbm_to_vmem [thread:$0]  %s32_s22, 15360, %s34_s24, [#allocation6], %s2072_s28, %s2072_s28, %s2073_s29  }
   0x8   :  { %s2074_s4 = smov [#allocation3]   ;;  %s2075_s6 = smov 64  }
   0x9   :  { %s20_s30 = sshll.u32 %s2074_s4, 4  ;;  %s2076_s7 = smov 4   ;;  %s21_s30 = int_to_ptr.vmem [resolvable:$true] %s20_s30 }
   0xa   :  { %26 = dma.hbm_to_vmem [thread:$0]  %s19_s27, 128, %s21_s30, [#allocation4], %s2075_s6, %s2075_s6, %s2076_s7  }
   0xb   :  { %s45_s9 = sshll.u32 %s2156_s2, 4  ;;  %s2077_s10 = smov [#allocation7]   ;;  %s46_s9 = int_to_ptr.hbm [resolvable:$true] %s45_s9 }
   0xc   :  { %s47_s11 = sshll.u32 %s2077_s10, 4  ;;  %s48_s11 = int_to_ptr.vmem [resolvable:$true] %s47_s11 }
   0xd   :  { %50 = dma.hbm_to_vmem [thread:$0]  %s46_s9, 64, %s48_s11, [#allocation6]  }
   0xe   :  { %2067 = dma.done.wait [#allocation4], 128  }
   0xf   :  { %2068 = vsyncadd [#allocation4], 4294967168 }
  0x10   :  { %2069 = dma.done.wait [#allocation6], 15424  }
  0x11   :  { %2070 = vsyncadd [#allocation6], 4294951872  ;;  %v1402_v1 = vld [vmem:[#allocation5 + $0x348] sm:$0xf]  ;;  %v1860_v2 = vld [vmem:[#allocation5 + $0x380] sm:$0xf0] }
  0x12   :  { %v1434_v3 = vld [vmem:[#allocation5 + $0x34c] sm:$0xf]  ;;  %v1403_v4 = vor.u32 %v1860_v2, %v1402_v1  ;;  %v1868_v5 = vld [vmem:[#allocation5 + $0x384] sm:$0xf0]  ;;  %v1466_v6 = vld [vmem:[#allocation5 + $0x350] sm:$0xf] }
  0x13   :  { %v1876_v7 = vld [vmem:[#allocation5 + $0x388] sm:$0xf0]  ;;  %v1435_v8 = vor.u32 %v1868_v5, %v1434_v3  ;;  %v1398_v10 = vld [vmem:[#allocation5 + $0x2d0] sm:$0xf]  ;;  %v1430_v12 = vld [vmem:[#allocation5 + $0x2d4] sm:$0xf] }
  0x14   :  { %v1467_v9 = vor.u32 %v1876_v7, %v1466_v6  ;;  %v1859_v11 = vld [vmem:[#allocation5 + $0x308] sm:$0xf0]  ;;  %139 = vmatpush.bf16.msra.mxu0 %v1403_v4  ;;  %v1867_v14 = vld [vmem:[#allocation5 + $0x30c] sm:$0xf0]  ;;  %v1462_v15 = vld [vmem:[#allocation5 + $0x2d8] sm:$0xf] }
  0x15   :  { %v1399_v13 = vor.u32 %v1859_v11, %v1398_v10  ;;  %v1875_v16 = vld [vmem:[#allocation5 + $0x310] sm:$0xf0]  ;;  %217 = vmatpush.bf16.msra.mxu1 %v1435_v8  ;;  %v1431_v17 = vor.u32 %v1867_v14, %v1430_v12  ;;  %v1394_v19 = vld [vmem:[#allocation5 + $0x258] sm:$0xf]  ;;  %v1426_v21 = vld [vmem:[#allocation5 + $0x25c] sm:$0xf] }
  0x16   :  { %297 = vmatpush.bf16.msra.mxu2 %v1467_v9  ;;  %v1463_v18 = vor.u32 %v1875_v16, %v1462_v15  ;;  %v1858_v20 = vld [vmem:[#allocation5 + $0x290] sm:$0xf0]  ;;  %v1866_v22 = vld [vmem:[#allocation5 + $0x294] sm:$0xf0]  ;;  %v1458_v23 = vld [vmem:[#allocation5 + $0x260] sm:$0xf] }
  0x17   :  { %v1874_v24 = vld [vmem:[#allocation5 + $0x298] sm:$0xf0]  ;;  %v1395_v25 = vor.u32 %v1858_v20, %v1394_v19  ;;  %v1427_v26 = vor.u32 %v1866_v22, %v1426_v21  ;;  %v1390_v28 = vld [vmem:[#allocation5 + $0x1e0] sm:$0xf]  ;;  %v1422_v30 = vld [vmem:[#allocation5 + $0x1e4] sm:$0xf] }
  0x18   :  { %140 = vmatpush.bf16.msra.mxu0 %v1399_v13  ;;  %v1459_v27 = vor.u32 %v1874_v24, %v1458_v23  ;;  %v1857_v29 = vld [vmem:[#allocation5 + $0x218] sm:$0xf0]  ;;  %v1865_v31 = vld [vmem:[#allocation5 + $0x21c] sm:$0xf0]  ;;  %v1454_v32 = vld [vmem:[#allocation5 + $0x1e8] sm:$0xf] }
  0x19   :  { %218 = vmatpush.bf16.msra.mxu1 %v1431_v17  ;;  %v1873_v33 = vld [vmem:[#allocation5 + $0x220] sm:$0xf0]  ;;  %v1498_v34 = vld [vmem:[#allocation5 + $0x354] sm:$0xf]  ;;  %v1884_v35 = vld [vmem:[#allocation5 + $0x38c] sm:$0xf0]  ;;  %v1391_v36 = vor.u32 %v1857_v29, %v1390_v28  ;;  %v1423_v40 = vor.u32 %v1865_v31, %v1422_v30 }
  0x1a   :  { %298 = vmatpush.bf16.msra.mxu2 %v1463_v18  ;;  %v1386_v37 = vld [vmem:[#allocation5 + $0x168] sm:$0xf]  ;;  %v1856_v38 = vld [vmem:[#allocation5 + $0x1a0] sm:$0xf0]  ;;  %v1499_v39 = vor.u32 %v1884_v35, %v1498_v34  ;;  %v1455_v41 = vor.u32 %v1873_v33, %v1454_v32  ;;  %v1418_v42 = vld [vmem:[#allocation5 + $0x16c] sm:$0xf] }
  0x1b   :  { %v1864_v43 = vld [vmem:[#allocation5 + $0x1a4] sm:$0xf0]  ;;  %v1494_v44 = vld [vmem:[#allocation5 + $0x2dc] sm:$0xf]  ;;  %v1450_v45 = vld [vmem:[#allocation5 + $0x170] sm:$0xf]  ;;  %v1387_v49 = vor.u32 %v1856_v38, %v1386_v37 }
  0x1c   :  { %141 = vmatpush.bf16.msra.mxu0 %v1395_v25  ;;  %v1872_v46 = vld [vmem:[#allocation5 + $0x1a8] sm:$0xf0]  ;;  %377 = vmatpush.bf16.msra.mxu3 %v1499_v39  ;;  %v1883_v47 = vld [vmem:[#allocation5 + $0x314] sm:$0xf0]  ;;  %v1490_v50 = vld [vmem:[#allocation5 + $0x264] sm:$0xf]  ;;  %v1419_v52 = vor.u32 %v1864_v43, %v1418_v42 }
  0x1d   :  { %219 = vmatpush.bf16.msra.mxu1 %v1427_v26  ;;  %v1495_v48 = vor.u32 %v1883_v47, %v1494_v44  ;;  %v1882_v51 = vld [vmem:[#allocation5 + $0x29c] sm:$0xf0]  ;;  %v1451_v53 = vor.u32 %v1872_v46, %v1450_v45  ;;  %v1382_v54 = vld [vmem:[#allocation5 + $0xf0] sm:$0xf]  ;;  %v1855_v55 = vld [vmem:[#allocation5 + $0x128] sm:$0xf0] }
  0x1e   :  { %299 = vmatpush.bf16.msra.mxu2 %v1459_v27  ;;  %v1414_v56 = vld [vmem:[#allocation5 + $0xf4] sm:$0xf]  ;;  %v1863_v57 = vld [vmem:[#allocation5 + $0x12c] sm:$0xf0]  ;;  %v1446_v58 = vld [vmem:[#allocation5 + $0xf8] sm:$0xf]  ;;  %v1491_v60 = vor.u32 %v1882_v51, %v1490_v50  ;;  %v1383_v63 = vor.u32 %v1855_v55, %v1382_v54 }
  0x1f   :  { %v1871_v59 = vld [vmem:[#allocation5 + $0x130] sm:$0xf0]  ;;  %v1486_v61 = vld [vmem:[#allocation5 + $0x1ec] sm:$0xf]  ;;  %v1881_v62 = vld [vmem:[#allocation5 + $0x224] sm:$0xf0]  ;;  %v1415_v0 = vor.u32 %v1863_v57, %v1414_v56 }
  0x20   :  { %142 = vmatpush.bf16.msra.mxu0 %v1391_v36  ;;  %378 = vmatpush.bf16.msra.mxu3 %v1495_v48  ;;  %v1447_v1 = vor.u32 %v1871_v59, %v1446_v58  ;;  %v1378_v2 = vld [vmem:[#allocation5 + $0x78] sm:$0xf]  ;;  %v1854_v3 = vld [vmem:[#allocation5 + $0xb0] sm:$0xf0]  ;;  %v1410_v4 = vld [vmem:[#allocation5 + $0x7c] sm:$0xf]  ;;  %v1487_v8 = vor.u32 %v1881_v62, %v1486_v61 }
  0x21   :  { %220 = vmatpush.bf16.msra.mxu1 %v1423_v40  ;;  %v1862_v5 = vld [vmem:[#allocation5 + $0xb4] sm:$0xf0]  ;;  %v1442_v6 = vld [vmem:[#allocation5 + $0x80] sm:$0xf]  ;;  %v1870_v7 = vld [vmem:[#allocation5 + $0xb8] sm:$0xf0]  ;;  %v1379_v11 = vor.u32 %v1854_v3, %v1378_v2 }
  0x22   :  { %300 = vmatpush.bf16.msra.mxu2 %v1455_v41  ;;  %v1482_v9 = vld [vmem:[#allocation5 + $0x174] sm:$0xf]  ;;  %v1880_v10 = vld [vmem:[#allocation5 + $0x1ac] sm:$0xf0]  ;;  %v1374_v12 = vld [vmem:[#allocation5] sm:$0xf]  ;;  %v1411_v14 = vor.u32 %v1862_v5, %v1410_v4  ;;  %v1443_v15 = vor.u32 %v1870_v7, %v1442_v6 }
  0x23   :  { %v1853_v13 = vld [vmem:[#allocation5 + $0x38] sm:$0xf0]  ;;  %v1406_v16 = vld [vmem:[#allocation5 + $0x4] sm:$0xf]  ;;  %v1861_v17 = vld [vmem:[#allocation5 + $0x3c] sm:$0xf0]  ;;  %v1483_v22 = vor.u32 %v1880_v10, %v1482_v9 }
  0x24   :  { %143 = vmatpush.bf16.msra.mxu0 %v1387_v49  ;;  %379 = vmatpush.bf16.msra.mxu3 %v1491_v60  ;;  %v1438_v18 = vld [vmem:[#allocation5 + $0x8] sm:$0xf]  ;;  %v1869_v19 = vld [vmem:[#allocation5 + $0x40] sm:$0xf0]  ;;  %v1530_v20 = vld [vmem:[#allocation5 + $0x358] sm:$0xf]  ;;  %v1375_v26 = vor.u32 %v1853_v13, %v1374_v12  ;;  %v1407_v30 = vor.u32 %v1861_v17, %v1406_v16 }
  0x25   :  { %221 = vmatpush.bf16.msra.mxu1 %v1419_v52  ;;  %v1892_v21 = vld [vmem:[#allocation5 + $0x390] sm:$0xf0]  ;;  %v1562_v23 = vld [vmem:[#allocation5 + $0x35c] sm:$0xf]  ;;  %v1900_v24 = vld [vmem:[#allocation5 + $0x394] sm:$0xf0]  ;;  %v1439_v31 = vor.u32 %v1869_v19, %v1438_v18 }
  0x26   :  { %301 = vmatpush.bf16.msra.mxu2 %v1451_v53  ;;  %v1594_v25 = vld [vmem:[#allocation5 + $0x360] sm:$0xf]  ;;  %v1908_v27 = vld [vmem:[#allocation5 + $0x398] sm:$0xf0]  ;;  %v1879_v29 = vld [vmem:[#allocation5 + $0x134] sm:$0xf0]  ;;  %v1531_v32 = vor.u32 %v1892_v21, %v1530_v20  ;;  %v1563_v33 = vor.u32 %v1900_v24, %v1562_v23 }
  0x27   :  { %v1478_v28 = vld [vmem:[#allocation5 + $0xfc] sm:$0xf]  ;;  %v1526_v34 = vld [vmem:[#allocation5 + $0x2e0] sm:$0xf]  ;;  %v1558_v36 = vld [vmem:[#allocation5 + $0x2e4] sm:$0xf]  ;;  %v1595_v37 = vor.u32 %v1908_v27, %v1594_v25 }
  0x28   :  { %144 = vmatpush.bf16.msra.mxu0 %v1383_v63  ;;  %380 = vmatpush.bf16.msra.mxu3 %v1487_v8  ;;  %v1891_v35 = vld [vmem:[#allocation5 + $0x318] sm:$0xf0]  ;;  %v1899_v38 = vld [vmem:[#allocation5 + $0x31c] sm:$0xf0]  ;;  %v1590_v39 = vld [vmem:[#allocation5 + $0x2e8] sm:$0xf]  ;;  %v1479_v41 = vor.u32 %v1879_v29, %v1478_v28 }
  0x29   :  { %222 = vmatpush.bf16.msra.mxu1 %v1415_v0  ;;  %v1907_v40 = vld [vmem:[#allocation5 + $0x320] sm:$0xf0]  ;;  %v1878_v43 = vld [vmem:[#allocation5 + $0xbc] sm:$0xf0]  ;;  %v2120_v44 = vld [vmem:[#allocation3] sm:$0xff]  ;;  %v1527_v45 = vor.u32 %v1891_v35, %v1526_v34  ;;  %v1559_v46 = vor.u32 %v1899_v38, %v1558_v36  ;;  %vm1359_vm2 = vcmask 7168  }
  0x2a   :  { %302 = vmatpush.bf16.msra.mxu2 %v1447_v1  ;;  %v1474_v42 = vld [vmem:[#allocation5 + $0x84] sm:$0xf]  ;;  %v1522_v47 = vld [vmem:[#allocation5 + $0x268] sm:$0xf]  ;;  %v1591_v49 = vor.u32 %v1907_v40, %v1590_v39  ;;  %v1554_v50 = vld [vmem:[#allocation5 + $0x26c] sm:$0xf] }
  0x2b   :  { %v1890_v48 = vld [vmem:[#allocation5 + $0x2a0] sm:$0xf0]  ;;  %v1898_v51 = vld [vmem:[#allocation5 + $0x2a4] sm:$0xf0]  ;;  %v1586_v52 = vld [vmem:[#allocation5 + $0x270] sm:$0xf]  ;;  %v1475_v53 = vor.u32 %v1878_v43, %v1474_v42 }
  0x2c   :  { %145 = vmatpush.bf16.msra.mxu0 %v1379_v11  ;;  %381 = vmatpush.bf16.msra.mxu3 %v1483_v22  ;;  %v1906_v54 = vld [vmem:[#allocation5 + $0x2a8] sm:$0xf0]  ;;  %v1877_v56 = vld [vmem:[#allocation5 + $0x44] sm:$0xf0]  ;;  %v1626_v57 = vld [vmem:[#allocation5 + $0x364] sm:$0xf]  ;;  %v1523_v59 = vor.u32 %v1890_v48, %v1522_v47  ;;  %v1555_v60 = vor.u32 %v1898_v51, %v1554_v50 }
  0x2d   :  { %223 = vmatpush.bf16.msra.mxu1 %v1411_v14  ;;  %v1470_v55 = vld [vmem:[#allocation5 + $0xc] sm:$0xf]  ;;  %v1916_v58 = vld [vmem:[#allocation5 + $0x39c] sm:$0xf0]  ;;  %v1518_v61 = vld [vmem:[#allocation5 + $0x1f0] sm:$0xf]  ;;  %v1587_v62 = vor.u32 %v1906_v54, %v1586_v52 }
  0x2e   :  { %303 = vmatpush.bf16.msra.mxu2 %v1443_v15  ;;  %v1889_v63 = vld [vmem:[#allocation5 + $0x228] sm:$0xf0]  ;;  %v1550_v0 = vld [vmem:[#allocation5 + $0x1f4] sm:$0xf]  ;;  %v1897_v1 = vld [vmem:[#allocation5 + $0x22c] sm:$0xf0]  ;;  %v1471_v2 = vor.u32 %v1877_v56, %v1470_v55  ;;  %v1627_v5 = vor.u32 %v1916_v58, %v1626_v57 }
  0x2f   :  { %v1582_v3 = vld [vmem:[#allocation5 + $0x1f8] sm:$0xf]  ;;  %v1905_v4 = vld [vmem:[#allocation5 + $0x230] sm:$0xf0]  ;;  %v1622_v6 = vld [vmem:[#allocation5 + $0x2ec] sm:$0xf]  ;;  %v1519_v8 = vor.u32 %v1889_v63, %v1518_v61  ;;  %v1551_v9 = vor.u32 %v1897_v1, %v1550_v0 }
  0x30   :  { %146 = vmatpush.bf16.msra.mxu0 %v1375_v26  ;;  %382 = vmatpush.bf16.msra.mxu3 %v1479_v41  ;;  %v1915_v7 = vld [vmem:[#allocation5 + $0x324] sm:$0xf0]  ;;  %v1514_v10 = vld [vmem:[#allocation5 + $0x178] sm:$0xf]  ;;  %v1583_v11 = vor.u32 %v1905_v4, %v1582_v3  ;;  %v1888_v12 = vld [vmem:[#allocation5 + $0x1b0] sm:$0xf0] }
  0x31   :  { %224 = vmatpush.bf16.msra.mxu1 %v1407_v30  ;;  %v1546_v13 = vld [vmem:[#allocation5 + $0x17c] sm:$0xf]  ;;  %v1896_v14 = vld [vmem:[#allocation5 + $0x1b4] sm:$0xf0]  ;;  %v1578_v15 = vld [vmem:[#allocation5 + $0x180] sm:$0xf]  ;;  %v1623_v17 = vor.u32 %v1915_v7, %v1622_v6  ;;  %v1515_v20 = vor.u32 %v1888_v12, %v1514_v10 }
  0x32   :  { %304 = vmatpush.bf16.msra.mxu2 %v1439_v31  ;;  %v1904_v16 = vld [vmem:[#allocation5 + $0x1b8] sm:$0xf0]  ;;  %v1618_v18 = vld [vmem:[#allocation5 + $0x274] sm:$0xf]  ;;  %v1914_v19 = vld [vmem:[#allocation5 + $0x2ac] sm:$0xf0]  ;;  %v1547_v21 = vor.u32 %v1896_v14, %v1546_v13 }
  0x33   :  { %147 = vmatmul.bf16.vlgmr.msra.gmra.mxu0 %v2120_v44  ;;  %v1510_v22 = vld [vmem:[#allocation5 + $0x100] sm:$0xf]  ;;  %v1579_v23 = vor.u32 %v1904_v16, %v1578_v15  ;;  %v1887_v24 = vld [vmem:[#allocation5 + $0x138] sm:$0xf0]  ;;  %v1542_v25 = vld [vmem:[#allocation5 + $0x104] sm:$0xf]  ;;  %v1619_v29 = vor.u32 %v1914_v19, %v1618_v18 }
  0x34   :  { %457 = vmatpush.bf16.msrb.mxu0 %v1531_v32  ;;  %225 = vmatmul.bf16.vlgmr.msra.gmra.mxu1 %v2120_v44  ;;  %v1895_v26 = vld [vmem:[#allocation5 + $0x13c] sm:$0xf0]  ;;  %v1574_v27 = vld [vmem:[#allocation5 + $0x108] sm:$0xf]  ;;  %v1903_v28 = vld [vmem:[#allocation5 + $0x140] sm:$0xf0]  ;;  %v1511_v32 = vor.u32 %v1887_v24, %v1510_v22 }
  0x35   :  { %537 = vmatpush.bf16.msrb.mxu1 %v1563_v33  ;;  %305 = vmatmul.bf16.vlgmr.msra.gmra.mxu2 %v2120_v44  ;;  %v1614_v30 = vld [vmem:[#allocation5 + $0x1fc] sm:$0xf]  ;;  %v1913_v31 = vld [vmem:[#allocation5 + $0x234] sm:$0xf0]  ;;  %v1543_v33 = vor.u32 %v1895_v26, %v1542_v25  ;;  %v1506_v34 = vld [vmem:[#allocation5 + $0x88] sm:$0xf]  ;;  %v1575_v35 = vor.u32 %v1903_v28, %v1574_v27 }
  0x36   :  { %631 = vmatpush.bf16.msrb.mxu2 %v1595_v37  ;;  %383 = vmatpush.bf16.msra.mxu3 %v1475_v53  ;;  %v1886_v36 = vld [vmem:[#allocation5 + $0xc0] sm:$0xf0]  ;;  %v1538_v37 = vld [vmem:[#allocation5 + $0x8c] sm:$0xf]  ;;  %v1894_v38 = vld [vmem:[#allocation5 + $0xc4] sm:$0xf0]  ;;  %v1615_v41 = vor.u32 %v1913_v31, %v1614_v30 }
  0x37   :  { %v1570_v39 = vld [vmem:[#allocation5 + $0x90] sm:$0xf]  ;;  %v1902_v40 = vld [vmem:[#allocation5 + $0xc8] sm:$0xf0]  ;;  %v1610_v42 = vld [vmem:[#allocation5 + $0x184] sm:$0xf] }
  0x38   :  { %458 = vmatpush.bf16.msrb.mxu0 %v1527_v45  ;;  %v1912_v43 = vld [vmem:[#allocation5 + $0x1bc] sm:$0xf0]  ;;  %v1507_v45 = vor.u32 %v1886_v36, %v1506_v34  ;;  %v1502_v47 = vld [vmem:[#allocation5 + $0x10] sm:$0xf]  ;;  %v1885_v48 = vld [vmem:[#allocation5 + $0x48] sm:$0xf0]  ;;  %v1571_v50 = vor.u32 %v1902_v40, %v1570_v39 }
  0x39   :  { %538 = vmatpush.bf16.msrb.mxu1 %v1559_v46  ;;  %v1539_v46 = vor.u32 %v1894_v38, %v1538_v37  ;;  %v1893_v51 = vld [vmem:[#allocation5 + $0x4c] sm:$0xf0]  ;;  %v1566_v52 = vld [vmem:[#allocation5 + $0x18] sm:$0xf]  ;;  %v1901_v53 = vld [vmem:[#allocation5 + $0x50] sm:$0xf0]  ;;  %v1611_v57 = vor.u32 %v1912_v43, %v1610_v42  ;;  %v1503_v61 = vor.u32 %v1885_v48, %v1502_v47 }
  0x3a   :  { %632 = vmatpush.bf16.msrb.mxu2 %v1591_v49  ;;  %384 = vmatpush.bf16.msra.mxu3 %v1471_v2  ;;  %v1534_v49 = vld [vmem:[#allocation5 + $0x14] sm:$0xf]  ;;  %v1658_v54 = vld [vmem:[#allocation5 + $0x368] sm:$0xf]  ;;  %v1924_v55 = vld [vmem:[#allocation5 + $0x3a0] sm:$0xf0]  ;;  %v1567_v63 = vor.u32 %v1901_v53, %v1566_v52 }
  0x3b   :  { %v1690_v56 = vld [vmem:[#allocation5 + $0x36c] sm:$0xf]  ;;  %v1932_v58 = vld [vmem:[#allocation5 + $0x3a4] sm:$0xf0]  ;;  %v1659_v0 = vor.u32 %v1924_v55, %v1658_v54  ;;  %v1686_v7 = vld [vmem:[#allocation5 + $0x2f4] sm:$0xf] }
  0x3c   :  { %459 = vmatpush.bf16.msrb.mxu0 %v1523_v59  ;;  %v1722_v59 = vld [vmem:[#allocation5 + $0x370] sm:$0xf]  ;;  %v1606_v1 = vld [vmem:[#allocation5 + $0x10c] sm:$0xf]  ;;  %v1911_v2 = vld [vmem:[#allocation5 + $0x144] sm:$0xf0]  ;;  %v1691_v3 = vor.u32 %v1932_v58, %v1690_v56 }
  0x3d   :  { %539 = vmatpush.bf16.msrb.mxu1 %v1555_v60  ;;  %385 = vmatmul.bf16.vlgmr.msra.gmra.mxu3 %v2120_v44  ;;  %v1940_v60 = vld [vmem:[#allocation5 + $0x3a8] sm:$0xf0]  ;;  %v1939_v10 = vld [vmem:[#allocation5 + $0x330] sm:$0xf0]  ;;  %v1910_v14 = vld [vmem:[#allocation5 + $0xcc] sm:$0xf0] }
  0x3e   :  { %633 = vmatpush.bf16.msrb.mxu2 %v1587_v62  ;;  %709 = vmatpush.bf16.msrb.mxu3 %v1627_v5  ;;  %v1535_v62 = vor.u32 %v1893_v51, %v1534_v49  ;;  %v1723_v4 = vor.u32 %v1940_v60, %v1722_v59  ;;  %v1654_v5 = vld [vmem:[#allocation5 + $0x2f0] sm:$0xf]  ;;  %v1923_v6 = vld [vmem:[#allocation5 + $0x328] sm:$0xf0]  ;;  %v1602_v13 = vld [vmem:[#allocation5 + $0x94] sm:$0xf] }
  0x3f   :  { %v1655_v12 = vor.u32 %v1923_v6, %v1654_v5  ;;  %v1922_v18 = vld [vmem:[#allocation5 + $0x2b0] sm:$0xf0]  ;;  %v1682_v19 = vld [vmem:[#allocation5 + $0x27c] sm:$0xf]  ;;  %v1646_v24 = vld [vmem:[#allocation5 + $0x200] sm:$0xf] }
  0x40   :  { %460 = vmatpush.bf16.msrb.mxu0 %v1519_v8  ;;  %v1931_v8 = vld [vmem:[#allocation5 + $0x32c] sm:$0xf0]  ;;  %v1938_v22 = vld [vmem:[#allocation5 + $0x2b8] sm:$0xf0]  ;;  %v1909_v28 = vld [vmem:[#allocation5 + $0x54] sm:$0xf0] }
  0x41   :  { %540 = vmatpush.bf16.msrb.mxu1 %v1551_v9  ;;  %v1718_v9 = vld [vmem:[#allocation5 + $0x2f8] sm:$0xf]  ;;  %v1687_v15 = vor.u32 %v1931_v8, %v1686_v7  ;;  %v1921_v26 = vld [vmem:[#allocation5 + $0x238] sm:$0xf0]  ;;  %v1678_v31 = vld [vmem:[#allocation5 + $0x204] sm:$0xf] }
  0x42   :  { %634 = vmatpush.bf16.msrb.mxu2 %v1583_v11  ;;  %710 = vmatpush.bf16.msrb.mxu3 %v1623_v17  ;;  %v1607_v11 = vor.u32 %v1911_v2, %v1606_v1  ;;  %v1719_v16 = vor.u32 %v1939_v10, %v1718_v9  ;;  %v1650_v17 = vld [vmem:[#allocation5 + $0x278] sm:$0xf]  ;;  %v1598_v27 = vld [vmem:[#allocation5 + $0x1c] sm:$0xf]  ;;  %v1929_v34 = vld [vmem:[#allocation5 + $0x23c] sm:$0xf0]  ;;  %v1647_v40 = vor.u32 %v1921_v26, %v1646_v24 }
  0x43   :  { %v1651_v25 = vor.u32 %v1922_v18, %v1650_v17  ;;  %v1937_v36 = vld [vmem:[#allocation5 + $0x240] sm:$0xf0]  ;;  %v1599_v37 = vor.u32 %v1909_v28, %v1598_v27  ;;  %v1642_v38 = vld [vmem:[#allocation5 + $0x188] sm:$0xf]  ;;  %v1706_v43 = vld [vmem:[#allocation5 + $0x190] sm:$0xf]  ;;  %v1679_v47 = vor.u32 %v1929_v34, %v1678_v31 }
  0x44   :  { %461 = vmatpush.bf16.msrb.mxu0 %v1515_v20  ;;  %v1930_v20 = vld [vmem:[#allocation5 + $0x2b4] sm:$0xf0]  ;;  %v1920_v39 = vld [vmem:[#allocation5 + $0x1c0] sm:$0xf0]  ;;  %v1928_v42 = vld [vmem:[#allocation5 + $0x1c4] sm:$0xf0] }
  0x45   :  { %541 = vmatpush.bf16.msrb.mxu1 %v1547_v21  ;;  %v1714_v21 = vld [vmem:[#allocation5 + $0x280] sm:$0xf]  ;;  %v1750_v49 = vld [vmem:[#allocation5 + $0x2fc] sm:$0xf]  ;;  %v1638_v51 = vld [vmem:[#allocation5 + $0x110] sm:$0xf]  ;;  %v1643_v53 = vor.u32 %v1920_v39, %v1642_v38 }
  0x46   :  { %635 = vmatpush.bf16.msrb.mxu2 %v1579_v23  ;;  %711 = vmatpush.bf16.msrb.mxu3 %v1619_v29  ;;  %v1603_v23 = vor.u32 %v1910_v14, %v1602_v13  ;;  %v1683_v29 = vor.u32 %v1930_v20, %v1682_v19  ;;  %v1715_v30 = vor.u32 %v1938_v22, %v1714_v21  ;;  %v1919_v52 = vld [vmem:[#allocation5 + $0x148] sm:$0xf0]  ;;  %v1670_v54 = vld [vmem:[#allocation5 + $0x114] sm:$0xf]  ;;  %v1927_v55 = vld [vmem:[#allocation5 + $0x14c] sm:$0xf0] }
  0x47   :  { %v1702_v56 = vld [vmem:[#allocation5 + $0x118] sm:$0xf]  ;;  %v1746_v60 = vld [vmem:[#allocation5 + $0x284] sm:$0xf]  ;;  %v1918_v1 = vld [vmem:[#allocation5 + $0xd0] sm:$0xf0] }
  0x48   :  { %462 = vmatpush.bf16.msrb.mxu0 %v1511_v32  ;;  %v1754_v32 = vld [vmem:[#allocation5 + $0x374] sm:$0xf]  ;;  %v1666_v5 = vld [vmem:[#allocation5 + $0x9c] sm:$0xf]  ;;  %v1742_v6 = vld [vmem:[#allocation5 + $0x20c] sm:$0xf] }
  0x49   :  { %542 = vmatpush.bf16.msrb.mxu1 %v1543_v33  ;;  %v1948_v33 = vld [vmem:[#allocation5 + $0x3ac] sm:$0xf0]  ;;  %v1945_v7 = vld [vmem:[#allocation5 + $0x244] sm:$0xf0]  ;;  %v1926_v8 = vld [vmem:[#allocation5 + $0xd4] sm:$0xf0] }
  0x4a   :  { %636 = vmatpush.bf16.msrb.mxu2 %v1575_v35  ;;  %712 = vmatpush.bf16.msrb.mxu3 %v1615_v41  ;;  %v1710_v35 = vld [vmem:[#allocation5 + $0x208] sm:$0xf]  ;;  %v1674_v41 = vld [vmem:[#allocation5 + $0x18c] sm:$0xf]  ;;  %v1698_v9 = vld [vmem:[#allocation5 + $0xa0] sm:$0xf] }
  0x4b   :  { %v1711_v48 = vor.u32 %v1937_v36, %v1710_v35  ;;  %v1675_v58 = vor.u32 %v1928_v42, %v1674_v41  ;;  %v1934_v10 = vld [vmem:[#allocation5 + $0xd8] sm:$0xf0]  ;;  %v1662_v14 = vld [vmem:[#allocation5 + $0x24] sm:$0xf]  ;;  %v1925_v18 = vld [vmem:[#allocation5 + $0x5c] sm:$0xf0] }
  0x4c   :  { %463 = vmatpush.bf16.msrb.mxu0 %v1507_v45  ;;  %v1936_v45 = vld [vmem:[#allocation5 + $0x1c8] sm:$0xf0]  ;;  %v1917_v13 = vld [vmem:[#allocation5 + $0x58] sm:$0xf0]  ;;  %v1699_v17 = vor.u32 %v1934_v10, %v1698_v9  ;;  %v1738_v19 = vld [vmem:[#allocation5 + $0x194] sm:$0xf]  ;;  %v1663_v31 = vor.u32 %v1925_v18, %v1662_v14 }
  0x4d   :  { %543 = vmatpush.bf16.msrb.mxu1 %v1539_v46  ;;  %v1755_v46 = vor.u32 %v1948_v33, %v1754_v32  ;;  %v1707_v59 = vor.u32 %v1936_v45, %v1706_v43  ;;  %v1944_v20 = vld [vmem:[#allocation5 + $0x1cc] sm:$0xf0]  ;;  %v1694_v21 = vld [vmem:[#allocation5 + $0x28] sm:$0xf]  ;;  %v1933_v22 = vld [vmem:[#allocation5 + $0x60] sm:$0xf0] }
  0x4e   :  { %637 = vmatpush.bf16.msrb.mxu2 %v1571_v50  ;;  %713 = vmatpush.bf16.msrb.mxu3 %v1611_v57  ;;  %v1947_v50 = vld [vmem:[#allocation5 + $0x334] sm:$0xf0]  ;;  %v1956_v24 = vld [vmem:[#allocation5 + $0x3b0] sm:$0xf0]  ;;  %v1850_v28 = vld [vmem:[#allocation5 + $0x380] sm:$0xf]  ;;  %v1695_v32 = vor.u32 %v1933_v22, %v1694_v21 }
  0x4f   :  { %v1751_v57 = vor.u32 %v1947_v50, %v1750_v49  ;;  %v1964_v26 = vld [vmem:[#allocation5 + $0x3b4] sm:$0xf0]  ;;  %v1782_v35 = vld [vmem:[#allocation5 + $0x300] sm:$0xf]  ;;  %v1734_v36 = vld [vmem:[#allocation5 + $0x11c] sm:$0xf] }
  0x50   :  { %464 = vmatpush.bf16.msrb.mxu0 %v1503_v61  ;;  %v1946_v61 = vld [vmem:[#allocation5 + $0x2bc] sm:$0xf0]  ;;  %v1955_v39 = vld [vmem:[#allocation5 + $0x338] sm:$0xf0]  ;;  %v1846_v42 = vld [vmem:[#allocation5 + $0x308] sm:$0xf] }
  0x51   :  { %544 = vmatpush.bf16.msrb.mxu1 %v1535_v62  ;;  %v1935_v62 = vld [vmem:[#allocation5 + $0x150] sm:$0xf0]  ;;  %v1747_v2 = vor.u32 %v1946_v61, %v1746_v60  ;;  %v1963_v41 = vld [vmem:[#allocation5 + $0x33c] sm:$0xf0]  ;;  %v1971_v43 = vld [vmem:[#allocation5 + $0x340] sm:$0xf0] }
  0x52   :  { %638 = vmatpush.bf16.msrb.mxu2 %v1567_v63  ;;  %714 = vmatpush.bf16.msrb.mxu3 %v1607_v11  ;;  %v1639_v63 = vor.u32 %v1919_v52, %v1638_v51  ;;  %v1730_v49 = vld [vmem:[#allocation5 + $0xa4] sm:$0xf]  ;;  %v1942_v50 = vld [vmem:[#allocation5 + $0xdc] sm:$0xf0]  ;;  %v1847_v51 = vor.u32 %v1971_v43, %v1846_v42  ;;  %v1774_v60 = vld [vmem:[#allocation5 + $0x210] sm:$0xf] }
  0x53   :  { %465 = vmatmul.bf16.vlgmr.msrb.gmra.mxu0 %v2120_v44  ;;  %v1954_v52 = vld [vmem:[#allocation5 + $0x2c0] sm:$0xf0]  ;;  %v1726_v61 = vld [vmem:[#allocation5 + $0x2c] sm:$0xf]  ;;  %v1952_v10 = vld [vmem:[#allocation5 + $0x1d0] sm:$0xf0] }
  0x54   :  { %789 = vmatpush.bf16.msra.mxu0 %v1659_v0  ;;  %545 = vmatmul.bf16.vlgmr.msrb.gmra.mxu1 %v2120_v44  ;;  %v1634_v0 = vld [vmem:[#allocation5 + $0x98] sm:$0xf]  ;;  %v1968_v14 = vld [vmem:[#allocation5 + $0x1d8] sm:$0xf0]  ;;  %v1959_v21 = vld [vmem:[#allocation5 + $0x15c] sm:$0xf0] }
  0x55   :  { %869 = vmatpush.bf16.msra.mxu1 %v1691_v3  ;;  %639 = vmatmul.bf16.vlgmr.msrb.gmra.mxu2 %v2120_v44  ;;  %v1671_v3 = vor.u32 %v1927_v55, %v1670_v54  ;;  %v1635_v11 = vor.u32 %v1918_v1, %v1634_v0  ;;  %v1962_v54 = vld [vmem:[#allocation5 + $0x2c4] sm:$0xf0]  ;;  %v1842_v55 = vld [vmem:[#allocation5 + $0x290] sm:$0xf]  ;;  %v1953_v0 = vld [vmem:[#allocation5 + $0x248] sm:$0xf0] }
  0x56   :  { %949 = vmatpush.bf16.msra.mxu2 %v1723_v4  ;;  %715 = vmatpush.bf16.msrb.mxu3 %v1603_v23  ;;  %v1703_v4 = vor.u32 %v1935_v62, %v1702_v56  ;;  %v1786_v23 = vld [vmem:[#allocation5 + $0x378] sm:$0xf]  ;;  %v1970_v56 = vld [vmem:[#allocation5 + $0x2c8] sm:$0xf0]  ;;  %v1941_v62 = vld [vmem:[#allocation5 + $0x64] sm:$0xf0] }
  0x57   :  { %v1787_v33 = vor.u32 %v1956_v24, %v1786_v23  ;;  %v1806_v1 = vld [vmem:[#allocation5 + $0x214] sm:$0xf]  ;;  %v1830_v22 = vld [vmem:[#allocation5 + $0x128] sm:$0xf]  ;;  %v1967_v23 = vld [vmem:[#allocation5 + $0x160] sm:$0xf0] }
  0x58   :  { %790 = vmatpush.bf16.msra.mxu0 %v1655_v12  ;;  %v1630_v12 = vld [vmem:[#allocation5 + $0x20] sm:$0xf] }
  0x59   :  { %870 = vmatpush.bf16.msra.mxu1 %v1687_v15  ;;  %v1743_v15 = vor.u32 %v1945_v7, %v1742_v6  ;;  %v1631_v27 = vor.u32 %v1917_v13, %v1630_v12  ;;  %v1775_v6 = vor.u32 %v1953_v0, %v1774_v60  ;;  %v1960_v12 = vld [vmem:[#allocation5 + $0x1d4] sm:$0xf0]  ;;  %v1834_v13 = vld [vmem:[#allocation5 + $0x1a0] sm:$0xf] }
  0x5a   :  { %950 = vmatpush.bf16.msra.mxu2 %v1719_v16  ;;  %716 = vmatpush.bf16.msrb.mxu3 %v1599_v37  ;;  %v1667_v16 = vor.u32 %v1926_v8, %v1666_v5  ;;  %v1943_v37 = vld [vmem:[#allocation5 + $0x154] sm:$0xf0]  ;;  %v1727_v5 = vor.u32 %v1941_v62, %v1726_v61  ;;  %v1835_v18 = vor.u32 %v1968_v14, %v1834_v13  ;;  %v1980_v60 = vld [vmem:[#allocation7] ss:$0 sm:$0xff] }
  0x5b   :  { %v1735_v45 = vor.u32 %v1943_v37, %v1734_v36  ;;  %v1770_v8 = vld [vmem:[#allocation5 + $0x198] sm:$0xf]  ;;  %v1949_v37 = vld [vmem:[#allocation5 + $0x68] sm:$0xf0] }
  0x5c   :  { %791 = vmatpush.bf16.msra.mxu0 %v1651_v25  ;;  %v1818_v25 = vld [vmem:[#allocation5 + $0x37c] sm:$0xf] }
  0x5d   :  { %871 = vmatpush.bf16.msra.mxu1 %v1683_v29  ;;  %717 = vmatmul.bf16.vlgmr.msrb.gmra.mxu3 %v2120_v44  ;;  %v1972_v29 = vld [vmem:[#allocation5 + $0x3b8] sm:$0xf0]  ;;  %v1819_v34 = vor.u32 %v1964_v26, %v1818_v25  ;;  %v1762_v26 = vld [vmem:[#allocation5 + $0xa8] sm:$0xf] }
  0x5e   :  { %951 = vmatpush.bf16.msra.mxu2 %v1715_v30  ;;  %1045 = vmatpush.bf16.msra.mxu3 %v1755_v46  ;;  %v1739_v30 = vor.u32 %v1944_v20, %v1738_v19  ;;  %v1851_v38 = vor.u32 %v1972_v29, %v1850_v28  ;;  %v1783_v46 = vor.u32 %v1955_v39, %v1782_v35  ;;  %v1951_v19 = vld [vmem:[#allocation5 + $0x158] sm:$0xf0]  ;;  %v1798_v20 = vld [vmem:[#allocation5 + $0x124] sm:$0xf]  ;;  %v1794_v29 = vld [vmem:[#allocation5 + $0xac] sm:$0xf] }
  0x5f   :  { %v1799_v25 = vor.u32 %v1959_v21, %v1798_v20  ;;  %v1950_v28 = vld [vmem:[#allocation5 + $0xe0] sm:$0xf0]  ;;  %v1758_v35 = vld [vmem:[#allocation5 + $0x30] sm:$0xf]  ;;  %v1982_v20 = vld [vmem:[#allocation7 + $0x1] ss:$0 sm:$0xff] }
  0x60   :  { %792 = vmatpush.bf16.msra.mxu0 %v1647_v40  ;;  %v1814_v40 = vld [vmem:[#allocation5 + $0x304] sm:$0xf]  ;;  %v1957_v39 = vld [vmem:[#allocation5 + $0x6c] sm:$0xf0]  ;;  %v1759_v42 = vor.u32 %v1949_v37, %v1758_v35 }
  0x61   :  { %872 = vmatpush.bf16.msra.mxu1 %v1679_v47  ;;  %v1815_v47 = vor.u32 %v1963_v41, %v1814_v40  ;;  %v1822_v40 = vld [vmem:[#allocation5 + $0x38] sm:$0xf]  ;;  %v1965_v41 = vld [vmem:[#allocation5 + $0x70] sm:$0xf0] }
  0x62   :  { %952 = vmatpush.bf16.msra.mxu2 %v1711_v48  ;;  %1046 = vmatpush.bf16.msra.mxu3 %v1751_v57  ;;  %v1778_v48 = vld [vmem:[#allocation5 + $0x288] sm:$0xf]  ;;  %v1731_v57 = vor.u32 %v1942_v50, %v1730_v49 }
  0x64   :  { %793 = vmatpush.bf16.msra.mxu0 %v1643_v53  ;;  %v1810_v53 = vld [vmem:[#allocation5 + $0x28c] sm:$0xf] }
  0x65   :  { %873 = vmatpush.bf16.msra.mxu1 %v1675_v58  ;;  %v1779_v58 = vor.u32 %v1954_v52, %v1778_v48 }
  0x66   :  { %953 = vmatpush.bf16.msra.mxu2 %v1707_v59  ;;  %1047 = vmatpush.bf16.msra.mxu3 %v1747_v2  ;;  %v1811_v59 = vor.u32 %v1962_v54, %v1810_v53  ;;  %v1961_v2 = vld [vmem:[#allocation5 + $0x24c] sm:$0xf0] }
  0x67   :  { %v1807_v7 = vor.u32 %v1961_v2, %v1806_v1 }
  0x68   :  { %794 = vmatpush.bf16.msra.mxu0 %v1639_v63  ;;  %v1843_v63 = vor.u32 %v1970_v56, %v1842_v55 }
  0x69   :  { %874 = vmatpush.bf16.msra.mxu1 %v1671_v3  ;;  %v1838_v3 = vld [vmem:[#allocation5 + $0x218] sm:$0xf] }
  0x6a   :  { %954 = vmatpush.bf16.msra.mxu2 %v1703_v4  ;;  %1048 = vmatpush.bf16.msra.mxu3 %v1743_v15  ;;  %v1969_v4 = vld [vmem:[#allocation5 + $0x250] sm:$0xf0]  ;;  %v1771_v15 = vor.u32 %v1952_v10, %v1770_v8 }
  0x6b   :  { %v1839_v9 = vor.u32 %v1969_v4, %v1838_v3 }
  0x6c   :  { %795 = vmatpush.bf16.msra.mxu0 %v1635_v11  ;;  %v1802_v11 = vld [vmem:[#allocation5 + $0x19c] sm:$0xf] }
  0x6d   :  { %875 = vmatpush.bf16.msra.mxu1 %v1667_v16  ;;  %v1803_v16 = vor.u32 %v1960_v12, %v1802_v11 }
  0x6e   :  { %955 = vmatpush.bf16.msra.mxu2 %v1699_v17  ;;  %1049 = vmatpush.bf16.msra.mxu3 %v1739_v30  ;;  %v1766_v17 = vld [vmem:[#allocation5 + $0x120] sm:$0xf]  ;;  %v1958_v30 = vld [vmem:[#allocation5 + $0xe4] sm:$0xf0] }
  0x6f   :  { %v1767_v24 = vor.u32 %v1951_v19, %v1766_v17 }
  0x70   :  { %796 = vmatpush.bf16.msra.mxu0 %v1631_v27  ;;  %v1831_v27 = vor.u32 %v1967_v23, %v1830_v22 }
  0x71   :  { %876 = vmatpush.bf16.msra.mxu1 %v1663_v31  ;;  %v1826_v31 = vld [vmem:[#allocation5 + $0xb0] sm:$0xf] }
  0x72   :  { %956 = vmatpush.bf16.msra.mxu2 %v1695_v32  ;;  %1050 = vmatpush.bf16.msra.mxu3 %v1735_v45  ;;  %v1966_v32 = vld [vmem:[#allocation5 + $0xe8] sm:$0xf0]  ;;  %v1823_v45 = vor.u32 %v1965_v41, %v1822_v40 }
  0x73   :  { %797 = vmatmul.bf16.vlgmr.msra.gmra.mxu0 %v2120_v44  ;;  %v1827_v36 = vor.u32 %v1966_v32, %v1826_v31 }
  0x74   :  { %1123 = vmatpush.bf16.msrb.mxu0 %v1787_v33  ;;  %877 = vmatmul.bf16.vlgmr.msra.gmra.mxu1 %v2120_v44  ;;  %v1763_v33 = vor.u32 %v1950_v28, %v1762_v26 }
  0x75   :  { %1203 = vmatpush.bf16.msrb.mxu1 %v1819_v34  ;;  %957 = vmatmul.bf16.vlgmr.msra.gmra.mxu2 %v2120_v44  ;;  %v1795_v34 = vor.u32 %v1958_v30, %v1794_v29 }
  0x76   :  { %1283 = vmatpush.bf16.msrb.mxu2 %v1851_v38  ;;  %1051 = vmatpush.bf16.msra.mxu3 %v1731_v57  ;;  %v1790_v38 = vld [vmem:[#allocation5 + $0x34] sm:$0xf] }
  0x77   :  { %v1791_v43 = vor.u32 %v1957_v39, %v1790_v38 }
  0x78   :  { %1124 = vmatpush.bf16.msrb.mxu0 %v1783_v46 }
  0x79   :  { %1204 = vmatpush.bf16.msrb.mxu1 %v1815_v47 }
  0x7a   :  { %1284 = vmatpush.bf16.msrb.mxu2 %v1847_v51  ;;  %1052 = vmatpush.bf16.msra.mxu3 %v1727_v5 }
  0x7c   :  { %1125 = vmatpush.bf16.msrb.mxu0 %v1779_v58 }
  0x7d   :  { %1205 = vmatpush.bf16.msrb.mxu1 %v1811_v59  ;;  %1053 = vmatmul.bf16.vlgmr.msra.gmra.mxu3 %v2120_v44 }
  0x7e   :  { %1285 = vmatpush.bf16.msrb.mxu2 %v1843_v63 }
  0x80   :  { %1126 = vmatpush.bf16.msrb.mxu0 %v1775_v6 }
  0x81   :  { %1206 = vmatpush.bf16.msrb.mxu1 %v1807_v7 }
  0x82   :  { %1286 = vmatpush.bf16.msrb.mxu2 %v1839_v9 }
  0x84   :  { %1127 = vmatpush.bf16.msrb.mxu0 %v1771_v15 }
  0x85   :  { %1207 = vmatpush.bf16.msrb.mxu1 %v1803_v16 }
  0x86   :  { %1287 = vmatpush.bf16.msrb.mxu2 %v1835_v18 }
  0x88   :  { %1128 = vmatpush.bf16.msrb.mxu0 %v1767_v24 }
  0x89   :  { %1208 = vmatpush.bf16.msrb.mxu1 %v1799_v25 }
  0x8a   :  { %1288 = vmatpush.bf16.msrb.mxu2 %v1831_v27  ;;  %v1983_v27 = vld [vmem:[%s2157_s3 + $0x1] ss:$0 sm:$0xff] }
  0x8c   :  { %1129 = vmatpush.bf16.msrb.mxu0 %v1763_v33 }
  0x8d   :  { %1209 = vmatpush.bf16.msrb.mxu1 %v1795_v34 }
  0x8e   :  { %1289 = vmatpush.bf16.msrb.mxu2 %v1827_v36 }
  0x90   :  { %1130 = vmatpush.bf16.msrb.mxu0 %v1759_v42  ;;  %v1984_v42 = vld [vmem:[#allocation7 + $0x2] ss:$0 sm:$0xff] }
  0x91   :  { %1210 = vmatpush.bf16.msrb.mxu1 %v1791_v43 }
  0x92   :  { %1290 = vmatpush.bf16.msrb.mxu2 %v1823_v45 }
  0x93   :  { %1131 = vmatmul.bf16.vlgmr.msrb.gmra.mxu0 %v2120_v44 }
  0x94   :  { %1211 = vmatmul.bf16.vlgmr.msrb.gmra.mxu1 %v2120_v44 }
  0x95   :  { %1291 = vmatmul.bf16.vlgmr.msrb.gmra.mxu2 %v2120_v44  ;;  %v1981_v44 = vld [vmem:[%s2157_s3] ss:$0 sm:$0xff] }
  0xb0   :  { %v148_v46 = vpop.f32.mrf.mxu0 }
  0xb1   :  { %v226_v47 = vpop.f32.mrf.mxu1 }
  0xb2   :  { %v231_v48 = vmax.f32 %v148_v46, %v226_v47 }
  0xb8   :  { %v306_v49 = vpop.f32.mrf.mxu2  ;;  %v150_v50 = vpop.f32.mrf.mxu0 }
  0xb9   :  { %v228_v51 = vpop.f32.mrf.mxu1  ;;  %v311_v52 = vmax.f32 %v231_v48, %v306_v49 }
  0xba   :  { %v232_v55 = vmax.f32 %v150_v50, %v228_v51  ;;  %v1985_v50 = vld [vmem:[%s2157_s3 + $0x2] ss:$0 sm:$0xff] }
  0xc0   :  { %v386_v53 = vpop.f32.mrf.mxu3  ;;  %v308_v56 = vpop.f32.mrf.mxu2 }
  0xc1   :  { %v391_v54 = vmax.f32 %v311_v52, %v386_v53  ;;  %v312_v61 = vmax.f32 %v232_v55, %v308_v56 }
  0xc8   :  { %v388_v63 = vpop.f32.mrf.mxu3 }
  0xc9   :  { %v392_v1 = vmax.f32 %v312_v61, %v388_v63  ;;  %v1986_v63 = vld [vmem:[#allocation2] ss:$0 sm:$0xff] }
  0xd0   :  { %v466_v57 = vpop.f32.mrf.mxu0 }
  0xd1   :  { %v546_v58 = vpop.f32.mrf.mxu1  ;;  %v471_v59 = vmax.f32 %v391_v54, %v466_v57 }
  0xd3   :  { %v551_v62 = vmax.f32 %v471_v59, %v546_v58 }
  0xd5   :  { %v555_v0 = vadd.f32 %v1980_v60, %v551_v62 }
  0xd7   :  { %v557_v2 = vmax.f32 %v555_v0, 0.0 }
  0xd8   :  { %v468_v3 = vpop.f32.mrf.mxu0  ;;  %v640_v10 = vpop.f32.mrf.mxu2 }
  0xd9   :  { %v548_v4 = vpop.f32.mrf.mxu1  ;;  %v472_v5 = vmax.f32 %v392_v1, %v468_v3  ;;  %v561_v6 = vmul.f32 %v1981_v44, %v557_v2 }
  0xdb   :  { %v552_v7 = vmax.f32 %v472_v5, %v548_v4  ;;  %563 = vadd.xlane.f32.xlu0 %v561_v6 }
  0xdd   :  { %v556_v8 = vadd.f32 %v1980_v60, %v552_v7 }
  0xdf   :  { %v558_v9 = vmax.f32 %v556_v8, 0.0 }
  0xe0   :  { %v718_v12 = vpop.f32.mrf.mxu3  ;;  %v642_v14 = vpop.f32.mrf.mxu2 }
  0xe1   :  { %v562_v11 = vmul.f32 %v1981_v44, %v558_v9  ;;  %v723_v13 = vmax.f32 %v640_v10, %v718_v12 }
  0xe3   :  { %565 = vadd.xlane.f32.xlu0 %v562_v11 }
  0xe8   :  { %v720_v19 = vpop.f32.mrf.mxu3 }
  0xe9   :  { %v724_v22 = vmax.f32 %v642_v14, %v720_v19 }
  0xf0   :  { %v798_v15 = vpop.f32.mrf.mxu0 }
  0xf1   :  { %v803_v16 = vmax.f32 %v723_v13, %v798_v15  ;;  %v878_v17 = vpop.f32.mrf.mxu1 }
  0xf3   :  { %v883_v18 = vmax.f32 %v803_v16, %v878_v17 }
  0xf8   :  { %v958_v21 = vpop.f32.mrf.mxu2  ;;  %v800_v24 = vpop.f32.mrf.mxu0 }
  0xf9   :  { %v963_v23 = vmax.f32 %v883_v18, %v958_v21  ;;  %v804_v25 = vmax.f32 %v724_v22, %v800_v24  ;;  %v880_v28 = vpop.f32.mrf.mxu1 }
  0xfb   :  { %v967_v26 = vadd.f32 %v1982_v20, %v963_v23  ;;  %v884_v30 = vmax.f32 %v804_v25, %v880_v28 }
  0xfd   :  { %v969_v29 = vmax.f32 %v967_v26, 0.0 }
  0xff   :  { %v973_v31 = vmul.f32 %v1983_v27, %v969_v29 }
 0x100   :  { %v960_v32 = vpop.f32.mrf.mxu2  ;;  %v1054_v37 = vpop.f32.mrf.mxu3 }
 0x101   :  { %v964_v33 = vmax.f32 %v884_v30, %v960_v32  ;;  %975 = vadd.xlane.f32.xlu1 %v973_v31 }
 0x103   :  { %v968_v34 = vadd.f32 %v1982_v20, %v964_v33 }
 0x105   :  { %v970_v35 = vmax.f32 %v968_v34, 0.0 }
 0x107   :  { %v974_v36 = vmul.f32 %v1983_v27, %v970_v35 }
 0x108   :  { %v1056_v47 = vpop.f32.mrf.mxu3 }
 0x109   :  { %977 = vadd.xlane.f32.xlu1 %v974_v36 }
 0x110   :  { %v1132_v38 = vpop.f32.mrf.mxu0 }
 0x111   :  { %v1137_v39 = vmax.f32 %v1054_v37, %v1132_v38  ;;  %v1212_v40 = vpop.f32.mrf.mxu1 }
 0x113   :  { %v1217_v41 = vmax.f32 %v1137_v39, %v1212_v40 }
 0x118   :  { %v1292_v43 = vpop.f32.mrf.mxu2  ;;  %v1134_v46 = vpop.f32.mrf.mxu0 }
 0x119   :  { %v1297_v45 = vmax.f32 %v1217_v41, %v1292_v43  ;;  %v1138_v48 = vmax.f32 %v1056_v47, %v1134_v46  ;;  %v1214_v52 = vpop.f32.mrf.mxu1 }
 0x11b   :  { %v1301_v49 = vadd.f32 %v1984_v42, %v1297_v45  ;;  %v1218_v53 = vmax.f32 %v1138_v48, %v1214_v52 }
 0x11d   :  { %v1303_v51 = vmax.f32 %v1301_v49, 0.0 }
 0x11f   :  { %v1307_v54 = vmul.f32 %v1985_v50, %v1303_v51 }
 0x120   :  { %v1294_v55 = vpop.f32.mrf.mxu2 }
 0x121   :  { %v1298_v56 = vmax.f32 %v1218_v53, %v1294_v55  ;;  %1309 = vadd.xlane.f32.xlu2 %v1307_v54 }
 0x123   :  { %v1302_v57 = vadd.f32 %v1984_v42, %v1298_v56 }
 0x125   :  { %v1304_v58 = vmax.f32 %v1302_v57, 0.0 }
 0x127   :  { %v1308_v59 = vmul.f32 %v1985_v50, %v1304_v58 }
 0x129   :  { %1311 = vadd.xlane.f32.xlu2 %v1308_v59 }
 0x14e   :  { %v564_v61 = vpop.xlane.xlu0 %563 }
 0x156   :  { %v566_v4 = vpop.xlane.xlu0 %565 }
 0x174   :  { %v976_v60 = vpop.xlane.xlu1 %975 }
 0x175   :  { %v979_v62 = vadd.f32 %v976_v60, %v564_v61 }
 0x17c   :  { %v978_v2 = vpop.xlane.xlu1 %977 }
 0x17d   :  { %v980_v5 = vadd.f32 %v978_v2, %v566_v4 }
 0x194   :  { %v1310_v0 = vpop.xlane.xlu2 %1309 }
 0x195   :  { %v1313_v44 = vadd.f32 %v1310_v0, %v979_v62 }
 0x197   :  { %v1319_v1 = vadd.f32 %v1986_v63, %v1313_v44 }
 0x199   :  { %v1321_v3 = vsub.f32 0.0, %v1319_v1 }
 0x19b   :  { %v1323_v6 = vmul.f32 1.442695, %v1321_v3 }
 0x19c   :  { %v1312_v7 = vpop.xlane.xlu2 %1311 }
 0x19d   :  { %1987 = vpow2.f32 %v1323_v6  ;;  %v1314_v8 = vadd.f32 %v1312_v7, %v980_v5 }
 0x19f   :  { %v1320_v9 = vadd.f32 %v1986_v63, %v1314_v8 }
 0x1a1   :  { %v1322_v10 = vsub.f32 0.0, %v1320_v9 }
 0x1a3   :  { %v1988_v11 = vpop.eup %1987  ;;  %v1325_v12 = vmul.f32 1.442695, %v1322_v10 }
 0x1a4   :  { %v1327_v13 = vadd.f32 1.0, %v1988_v11 }
 0x1a5   :  { %1989 = vpow2.f32 %v1325_v12 }
 0x1a6   :  { %1991 = vrcp.f32 %v1327_v13  ;;  %v1340_v19 = vand.u32 2147483648, %v1327_v13  ;;  %v1338_v21 = vand.u32 2147483647, %v1327_v13  ;;  %vm1334_vm1 = vweird.f32 %v1327_v13 }
 0x1a8   :  { %v1341_v24 = vor.u32 1.1754944e-38, %v1340_v19  ;;  %vm1339_vm4 = vcmp.eq.f32.partialorder %v1338_v21, 8.507059e+37 }
 0x1ab   :  { %v1990_v14 = vpop.eup %1989 }
 0x1ac   :  { %v1992_v15 = vpop.eup %1991  ;;  %v1328_v16 = vadd.f32 1.0, %v1990_v14 }
 0x1ad   :  { %v1330_v17 = vmul.f32 %v1992_v15, %v1327_v13  ;;  %vm1335_vm0 = vweird.f32 %v1992_v15 }
 0x1ae   :  { %1993 = vrcp.f32 %v1328_v16  ;;  %vm1336_vm3 = vmor %vm1334_vm1, %vm1335_vm0  ;;  %v1355_v29 = vand.u32 2147483648, %v1328_v16  ;;  %v1353_v31 = vand.u32 2147483647, %v1328_v16  ;;  %vm1349_vm6 = vweird.f32 %v1328_v16 }
 0x1af   :  { %v1331_v18 = vsub.f32 1.0, %v1330_v17 }
 0x1b0   :  { %v1356_v33 = vor.u32 1.1754944e-38, %v1355_v29  ;;  %vm1354_vm8 = vcmp.eq.f32.partialorder %v1353_v31, 8.507059e+37 }
 0x1b1   :  { %v1332_v20 = vmul.f32 %v1992_v15, %v1331_v18 }
 0x1b3   :  { %v1333_v22 = vadd.f32 %v1992_v15, %v1332_v20 }
 0x1b4   :  { %v1994_v23 = vpop.eup %1993 }
 0x1b5   :  { %v1337_v25 = vsel %vm1336_vm3, %v1992_v15, %v1333_v22  ;;  %v1345_v26 = vmul.f32 %v1994_v23, %v1328_v16  ;;  %vm1350_vm5 = vweird.f32 %v1994_v23 }
 0x1b6   :  { %v1342_v27 = vsel %vm1339_vm4, %v1341_v24, %v1337_v25  ;;  %vm1351_vm7 = vmor %vm1349_vm6, %vm1350_vm5 }
 0x1b7   :  { %1360 = vst.msk [vmem:[%s2159_s5] sm:$0xff] %vm1359_vm2, %v1342_v27  ;;  %v1346_v28 = vsub.f32 1.0, %v1345_v26 }
 0x1b9   :  { %v1347_v30 = vmul.f32 %v1994_v23, %v1346_v28 }
 0x1bb   :  { %v1348_v32 = vadd.f32 %v1994_v23, %v1347_v30 }
 0x1bd   :  { %v1352_v34 = vsel %vm1351_vm7, %v1994_v23, %v1348_v32 }
 0x1be   :  { %v1357_v35 = vsel %vm1354_vm8, %v1356_v33, %v1352_v34 }
 0x1bf   :  { %1361 = vst.msk [vmem:[%s2159_s5 + $0x8] sm:$0xff] %vm1359_vm2, %v1357_v35 }
 0x1c0   :  { %1366 = vsyncpa [#allocation4], 1 }
 0x1c1   :  { %1367 = vsyncpa [#allocation6], 1 }

</bundles_post_ra>
